<compile_context>
chip_gen: v7x
topology: tpu7x:2x2x1
jax: 0.10.0
libtpu: 0.0.40
codegen_flags: <defaults>
</compile_context>

<pallas_src>
import functools

import numpy as np
import jax
import jax.numpy as jnp
from jax.experimental import pallas as pl
from jax.experimental.pallas import tpu as pltpu


# --------------------------- constant parameters ---------------------------

_RGB_FROM_HED = np.array(
    [[0.65, 0.70, 0.29],
     [0.07, 0.99, 0.11],
     [0.27, 0.57, 0.78]], dtype=np.float32)

# torch.linalg.inv(rgb_from_hed) — computed once on host (fixed module buffer).
_HED_FROM_RGB = np.linalg.inv(_RGB_FROM_HED).astype(np.float32)
_HED_M = tuple(tuple(float(v) for v in row) for row in _HED_FROM_RGB)

_EPS = 1e-6
_LOG_ADJUST = float(np.log(_EPS))            # log(1e-6) (negative)
_INV_LOG_ADJUST = 1.0 / _LOG_ADJUST          # multiply instead of divide

# ~2 MiB f32 block across the 3 channels -> elements per channel plane.
_TARGET_PLANE_ELEMS = (2 * 1024 * 1024) // (3 * 4)


# ------------------------------ Pallas kernel ------------------------------

def _rgb2hed_kernel(x_ref, o_ref, *, mat, inv_log_adjust, eps):
    """One (1, 3, TH, TW) tile: clamp -> log -> scale -> 3x3 mix -> relu.

    Each channel plane x_ref[0, c] is a dense (TH, TW) sublane x lane tile.
    `mat`, `inv_log_adjust`, `eps` are baked-in Python constants.
    """
    # y_c = log(clamp(x_c, eps)) / log(eps)   (log runs on the EUP slot)
    y0 = jnp.log(jnp.maximum(x_ref[0, 0], eps)) * inv_log_adjust
    y1 = jnp.log(jnp.maximum(x_ref[0, 1], eps)) * inv_log_adjust
    y2 = jnp.log(jnp.maximum(x_ref[0, 2], eps)) * inv_log_adjust

    # stains[..., j] = sum_c y_c * mat[c][j]; store each channel directly
    # (no concatenate, no extra block temporary), then clamp(min=0.0).
    for j in range(3):
        o_ref[0, j] = jnp.maximum(
            y0 * mat[0][j] + y1 * mat[1][j] + y2 * mat[2][j], 0.0)


# ------------------------------- Python glue -------------------------------

def _tile_sizes(N, H, W):
    """Pick (TH, TW, GH, GW) for a ~2 MiB (1, 3, TH, TW) f32 block."""
    # Lane (W) tiling: prefer full-width rows (contiguous DMA). Only cap W if
    # a single 8-row full-width slab would already blow the block budget.
    if W <= 128 or W * 8 <= _TARGET_PLANE_ELEMS:
        TW = W                                      # == full dim -> always legal
    else:
        TW = max(128, (_TARGET_PLANE_ELEMS // (8 * 128)) * 128)  # multiple of 128

    # Sublane (H) tiling: multiple of 8, or the full H.
    th = max(1, _TARGET_PLANE_ELEMS // TW)
    if th >= H:
        TH = H
    else:
        TH = max(8, (th // 8) * 8)
    GW = pl.cdiv(W, TW)

    # v7x megacore: keep at least 2 grid steps along the parallel axes when
    # there is only one image and one spatial tile.
    if N == 1 and GW == 1 and TH == H and H >= 16:
        TH = max(8, ((H // 2) // 8) * 8)
    GH = pl.cdiv(H, TH)
    return TH, TW, GH, GW


def rgb2hed(x):
    """JAX/Pallas equivalent of rgb2hed().forward(x) for NCHW float input."""
    N, C, H, W = x.shape
    assert C == 3, "rgb2hed expects 3 input channels"
    x = x.astype(jnp.float32)

    TH, TW, GH, GW = _tile_sizes(N, H, W)

    kernel = functools.partial(
        _rgb2hed_kernel, mat=_HED_M, inv_log_adjust=_INV_LOG_ADJUST, eps=_EPS)

    n_pix = N * H * W
    out = pl.pallas_call(
        kernel,
        out_shape=jax.ShapeDtypeStruct((N, C, H, W), jnp.float32),
        grid_spec=pltpu.PrefetchScalarGridSpec(
            num_scalar_prefetch=0,
            grid=(N, GH, GW),
            in_specs=[pl.BlockSpec((1, C, TH, TW), lambda n, i, j: (n, 0, i, j))],
            out_specs=pl.BlockSpec((1, C, TH, TW), lambda n, i, j: (n, 0, i, j)),
        ),
        compiler_params=pltpu.CompilerParams(
            dimension_semantics=("parallel", "parallel", "parallel")),
        cost_estimate=pl.CostEstimate(
            flops=24 * n_pix,                 # clamps + scale + 3x3 mix + relu
            transcendentals=3 * n_pix,        # 3 logs per pixel
            bytes_accessed=2 * 3 * n_pix * 4),
    )(x)
    return out


# Pure-JAX reference mirroring the PyTorch separate_stains math.
def _reference(x):
    m = jnp.asarray(_HED_FROM_RGB, jnp.float32)
    rgb = jnp.maximum(x.astype(jnp.float32), _EPS)
    log_adjust = jnp.log(jnp.float32(_EPS))
    rgb_hwc = jnp.transpose(rgb, (0, 2, 3, 1))              # b c h w -> b h w c
    stains = (jnp.log(rgb_hwc) / log_adjust) @ m
    stains = jnp.transpose(stains, (0, 3, 1, 2))            # b h w c -> b c h w
    return jnp.maximum(stains, 0.0)


if __name__ == "__main__":
    key = jax.random.PRNGKey(0)
    k0, k1 = jax.random.split(key)

    # Primary small test (matches the module's NCHW RGB contract).
    N, C, H, W = 2, 3, 16, 16
    x = jax.random.uniform(k0, (N, C, H, W), dtype=jnp.float32)
    out = jax.block_until_ready(rgb2hed(x))
    ref = _reference(x)
    assert out.shape == (N, C, H, W)
    assert jnp.allclose(out, ref, rtol=1e-5, atol=1e-5), (
        float(jnp.max(jnp.abs(out - ref))))

    # Secondary test: N=1 with H not a multiple of the H tile (exercises the
    # megacore split and masked partial trailing blocks, no pad/slice copies).
    x2 = jax.random.uniform(k1, (1, 3, 100, 256), dtype=jnp.float32)
    out2 = jax.block_until_ready(rgb2hed(x2))
    ref2 = _reference(x2)
    assert out2.shape == (1, 3, 100, 256)
    assert jnp.allclose(out2, ref2, rtol=1e-5, atol=1e-5), (
        float(jnp.max(jnp.abs(out2 - ref2))))

    print("KERNEL_OK")
</pallas_src>

<mosaic_0001>
module attributes {stable_mosaic.version = 11 : i64} {
  func.func @_rgb2hed_kernel(%arg0: i32, %arg1: i32, %arg2: i32, %arg3: memref<1x3x16x16xf32, #tpu.memory_space<vmem>>, %arg4: memref<1x3x16x16xf32, #tpu.memory_space<vmem>>) attributes {dimension_semantics = [#tpu.dimension_semantics<parallel>, #tpu.dimension_semantics<parallel>, #tpu.dimension_semantics<parallel>], iteration_bounds = array<i64: 2, 1, 1>, scalar_prefetch = 0 : i64, scratch_operands = 0 : i64, tpu.core_type = #tpu.core_type<tc>, window_params = [{transform_indices = @transform_0, window_bounds = array<i64: 1, 3, 16, 16>}, {transform_indices = @transform_1, window_bounds = array<i64: 1, 3, 16, 16>}]} {
    %c0 = arith.constant 0 : index
    %c0_0 = arith.constant 0 : index
    %c0_1 = arith.constant 0 : index
    %c0_2 = arith.constant 0 : index
    %0 = vector.load %arg3[%c0, %c0_0, %c0_1, %c0_2] : memref<1x3x16x16xf32, #tpu.memory_space<vmem>>, vector<1x1x16x16xf32>
    %1 = vector.shape_cast %0 : vector<1x1x16x16xf32> to vector<16x16xf32>
    %cst = arith.constant 9.99999997E-7 : f32
    %2 = vector.broadcast %cst : f32 to vector<16x16xf32>
    %3 = arith.maximumf %1, %2 : vector<16x16xf32>
    %4 = math.log %3 : vector<16x16xf32>
    %cst_3 = arith.constant -0.0723824129 : f32
    %5 = vector.broadcast %cst_3 : f32 to vector<16x16xf32>
    %6 = arith.mulf %4, %5 : vector<16x16xf32>
    %c0_4 = arith.constant 0 : index
    %c1 = arith.constant 1 : index
    %c0_5 = arith.constant 0 : index
    %c0_6 = arith.constant 0 : index
    %7 = vector.load %arg3[%c0_4, %c1, %c0_5, %c0_6] : memref<1x3x16x16xf32, #tpu.memory_space<vmem>>, vector<1x1x16x16xf32>
    %8 = vector.shape_cast %7 : vector<1x1x16x16xf32> to vector<16x16xf32>
    %cst_7 = arith.constant 9.99999997E-7 : f32
    %9 = vector.broadcast %cst_7 : f32 to vector<16x16xf32>
    %10 = arith.maximumf %8, %9 : vector<16x16xf32>
    %11 = math.log %10 : vector<16x16xf32>
    %cst_8 = arith.constant -0.0723824129 : f32
    %12 = vector.broadcast %cst_8 : f32 to vector<16x16xf32>
    %13 = arith.mulf %11, %12 : vector<16x16xf32>
    %c0_9 = arith.constant 0 : index
    %c2 = arith.constant 2 : index
    %c0_10 = arith.constant 0 : index
    %c0_11 = arith.constant 0 : index
    %14 = vector.load %arg3[%c0_9, %c2, %c0_10, %c0_11] : memref<1x3x16x16xf32, #tpu.memory_space<vmem>>, vector<1x1x16x16xf32>
    %15 = vector.shape_cast %14 : vector<1x1x16x16xf32> to vector<16x16xf32>
    %cst_12 = arith.constant 9.99999997E-7 : f32
    %16 = vector.broadcast %cst_12 : f32 to vector<16x16xf32>
    %17 = arith.maximumf %15, %16 : vector<16x16xf32>
    %18 = math.log %17 : vector<16x16xf32>
    %cst_13 = arith.constant -0.0723824129 : f32
    %19 = vector.broadcast %cst_13 : f32 to vector<16x16xf32>
    %20 = arith.mulf %18, %19 : vector<16x16xf32>
    %cst_14 = arith.constant 1.87798285 : f32
    %21 = vector.broadcast %cst_14 : f32 to vector<16x16xf32>
    %22 = arith.mulf %6, %21 : vector<16x16xf32>
    %cst_15 = arith.constant -0.0659080595 : f32
    %23 = vector.broadcast %cst_15 : f32 to vector<16x16xf32>
    %24 = arith.mulf %13, %23 : vector<16x16xf32>
    %25 = arith.addf %22, %24 : vector<16x16xf32>
    %cst_16 = arith.constant -0.601907432 : f32
    %26 = vector.broadcast %cst_16 : f32 to vector<16x16xf32>
    %27 = arith.mulf %20, %26 : vector<16x16xf32>
    %28 = arith.addf %25, %27 : vector<16x16xf32>
    %cst_17 = arith.constant 0.000000e+00 : f32
    %29 = vector.broadcast %cst_17 : f32 to vector<16x16xf32>
    %30 = arith.maximumf %28, %29 : vector<16x16xf32>
    %c0_18 = arith.constant 0 : index
    %c0_19 = arith.constant 0 : index
    %c0_20 = arith.constant 0 : index
    %c0_21 = arith.constant 0 : index
    %31 = vector.load %arg4[%c0_18, %c0_19, %c0_20, %c0_21] : memref<1x3x16x16xf32, #tpu.memory_space<vmem>>, vector<1x1x16x16xf32>
    %32 = vector.shape_cast %31 : vector<1x1x16x16xf32> to vector<16x16xf32>
    %33 = vector.shape_cast %30 : vector<16x16xf32> to vector<1x1x16x16xf32>
    tpu.vector_store %arg4[%c0_18, %c0_19, %c0_20, %c0_21], %33 {strides = array<i32>} : memref<1x3x16x16xf32, #tpu.memory_space<vmem>>, vector<1x1x16x16xf32>,
    %cst_22 = arith.constant -1.00767875 : f32
    %34 = vector.broadcast %cst_22 : f32 to vector<16x16xf32>
    %35 = arith.mulf %6, %34 : vector<16x16xf32>
    %cst_23 = arith.constant 1.13473034 : f32
    %36 = vector.broadcast %cst_23 : f32 to vector<16x16xf32>
    %37 = arith.mulf %13, %36 : vector<16x16xf32>
    %38 = arith.addf %35, %37 : vector<16x16xf32>
    %cst_24 = arith.constant -0.480414152 : f32
    %39 = vector.broadcast %cst_24 : f32 to vector<16x16xf32>
    %40 = arith.mulf %20, %39 : vector<16x16xf32>
    %41 = arith.addf %38, %40 : vector<16x16xf32>
    %cst_25 = arith.constant 0.000000e+00 : f32
    %42 = vector.broadcast %cst_25 : f32 to vector<16x16xf32>
    %43 = arith.maximumf %41, %42 : vector<16x16xf32>
    %c0_26 = arith.constant 0 : index
    %c1_27 = arith.constant 1 : index
    %c0_28 = arith.constant 0 : index
    %c0_29 = arith.constant 0 : index
    %44 = vector.load %arg4[%c0_26, %c1_27, %c0_28, %c0_29] : memref<1x3x16x16xf32, #tpu.memory_space<vmem>>, vector<1x1x16x16xf32>
    %45 = vector.shape_cast %44 : vector<1x1x16x16xf32> to vector<16x16xf32>
    %46 = vector.shape_cast %43 : vector<16x16xf32> to vector<1x1x16x16xf32>
    tpu.vector_store %arg4[%c0_26, %c1_27, %c0_28, %c0_29], %46 {strides = array<i32>} : memref<1x3x16x16xf32, #tpu.memory_space<vmem>>, vector<1x1x16x16xf32>,
    %cst_30 = arith.constant -0.556115866 : f32
    %47 = vector.broadcast %cst_30 : f32 to vector<16x16xf32>
    %48 = arith.mulf %6, %47 : vector<16x16xf32>
    %cst_31 = arith.constant -0.135521799 : f32
    %49 = vector.broadcast %cst_31 : f32 to vector<16x16xf32>
    %50 = arith.mulf %13, %49 : vector<16x16xf32>
    %51 = arith.addf %48, %50 : vector<16x16xf32>
    %cst_32 = arith.constant 1.57358813 : f32
    %52 = vector.broadcast %cst_32 : f32 to vector<16x16xf32>
    %53 = arith.mulf %20, %52 : vector<16x16xf32>
    %54 = arith.addf %51, %53 : vector<16x16xf32>
    %cst_33 = arith.constant 0.000000e+00 : f32
    %55 = vector.broadcast %cst_33 : f32 to vector<16x16xf32>
    %56 = arith.maximumf %54, %55 : vector<16x16xf32>
    %c0_34 = arith.constant 0 : index
    %c2_35 = arith.constant 2 : index
    %c0_36 = arith.constant 0 : index
    %c0_37 = arith.constant 0 : index
    %57 = vector.load %arg4[%c0_34, %c2_35, %c0_36, %c0_37] : memref<1x3x16x16xf32, #tpu.memory_space<vmem>>, vector<1x1x16x16xf32>
    %58 = vector.shape_cast %57 : vector<1x1x16x16xf32> to vector<16x16xf32>
    %59 = vector.shape_cast %56 : vector<16x16xf32> to vector<1x1x16x16xf32>
    tpu.vector_store %arg4[%c0_34, %c2_35, %c0_36, %c0_37], %59 {strides = array<i32>} : memref<1x3x16x16xf32, #tpu.memory_space<vmem>>, vector<1x1x16x16xf32>,
    return
  }
  func.func @transform_0(%arg0: i32, %arg1: i32, %arg2: i32) -> (i32, i32, i32, i32) {
    %c0_i32 = arith.constant 0 : i32
    %c0_i32_0 = arith.constant 0 : i32
    return %arg0, %c0_i32, %arg1, %arg2 : i32, i32, i32, i32
  }
  func.func @transform_1(%arg0: i32, %arg1: i32, %arg2: i32) -> (i32, i32, i32, i32) {
    %c0_i32 = arith.constant 0 : i32
    %c0_i32_0 = arith.constant 0 : i32
    return %arg0, %c0_i32, %arg1, %arg2 : i32, i32, i32, i32
  }
}

</mosaic_0001>

<bundles_post_ra>
// kernel: tpu_custom_call.1
= control target key start
LH: loop header
LB: loop body
LE: loop exit
PB: predicated region body
PF: predicated region fallthrough
CT: control target
= control target key end

     0   :  { %6 = vsyncpa [#allocation3], 0  ;;  %s767_s0 = inlined_call_operand.hbm [shape: f32[2,3,16,16], index: 0, kind: input, shape index: {}]   ;;  %s768_s1 = inlined_call_operand.hbm [shape: f32[2,3,16,16], index: 1, kind: output, shape index: {}]  }
   0x1   :  { %8 = vsyncpa [#allocation3 + $0x1], 0 }
   0x2   :  { %9 = vsyncpa [#allocation4], 0 }
   0x3   :  { %11 = vsyncpa [#allocation4 + $0x1], 0  ;;  %s582_s6 = smov 0   ;;  %s584_s7 = smov 0  }
   0x4   :  { %s586_s8 = smov 0   ;;  %s588_s9 = smov 0  }
   0x5   :  { %s590_s10 = smov 0   ;;  %s592_s11 = smov 0  }
   0x6 LB: > { %s353_s12 = sadd.s32 4294967295, %s564_s11   ;;  %s354_s13 = sadd.s32 4294967294, %s564_s11   ;;  %s564_s11 = sphi %s592_s11, %s17_s11   ;;  %s560_s10 = sphi %s590_s10, %s783_s10   ;;  %s556_s9 = sphi %s588_s9, %s782_s9   ;;  %s552_s8 = sphi %s586_s8, %s781_s8   ;;  %s548_s7 = sphi %s584_s7, %s780_s7   ;;  %s544_s6 = sphi %s582_s6, %s779_s6  }
   0x7   : > { %s36_s14 = sadd.s32 1, %s560_s10  ;;  %s47_s15 = sadd.s32 1, %s552_s8 }
   0x8   : > { %p38_p0 = scmp.ge.s32.totalorder %s36_s14, 2  ;;  %p54_p1 = scmp.ne.s32.totalorder %s552_s8, %s548_s7 }
   0x9   : > { %p55_p2 = scmp.eq.s32.totalorder %s564_s11, 0  ;;  %p60_p3 = scmp.ne.s32.totalorder %s548_s7, %s544_s6 }
   0xa   : > { %s785_s14 = smov (%p38_p0, %s36_s14), 0  ;;  %p61_p5 = scmp.eq.s32.totalorder %s353_s12, 0 }
   0xb   : > { %p623_p4 = por %p55_p2, %p54_p1  ;;  %s40_s17 = ssub.s32 %s560_s10, %s785_s14 }
   0xc   : > { %p88_p6 = scmp.eq.s32.totalorder %s353_s12, 1  ;;  %p45_p7 = scmp.eq.s32.totalorder %s40_s17, 0 }
   0xd   : > { %p629_p8 = por %p61_p5, %p60_p3  ;;  %p94_p10 = scmp.eq.s32.totalorder %s354_s13, 1 }
   0xe   : > { %p633_p9 = por %p88_p6, %p54_p1  ;;  %p386_p13 = scmp.lt.s32.totalorder %s564_s11, 2 }
   0xf   : > { %s638_s20 = scalar_select %p45_p7, %s552_s8, %s47_s15  }
  0x10   : > { %s772_s19 = scalar_select %p633_p9, 1, 0 }
  0x11   : > { %p640_p11 = por %p94_p10, %p60_p3  ;;  %s114_s22 = sand.u32 1, %s552_s8  }
  0x12   : > { %s370_s23 = smul.u32 48, %s114_s22  ;;  %p650_p0 = pnand %p386_p13, %p623_p4 }
  0x13   : > { %s773_s21 = scalar_select %p640_p11, 1, 0 }
  0x14   : > { %s371_s24 = smul.u32 768, %s560_s10  ;;  %s118_s29 = scalar_lea.vmem [#allocation2], %s370_s23 }
  0x15   : > { %s128_s30 = sshll.u32 %s118_s29, 4  ;;  %s662_s2 = scalar_lea.sflag [#allocation3], %s114_s22  ;;  %s659_s30 = int_to_ptr.vmem [resolvable:$true] %s128_s30 }
  0x16   : > { %s657_s28 = scalar_lea.hbm %s767_s0, %s371_s24  ;;  %p454_p3 = pneg %p650_p0 }
  0x17   : > { %s452_s3 = scalar_lea.hbm %s657_s28, 768  ;;  %s457_s12 = scalar_lea.hbm %s767_s0, 1536 }
  0x18   : > { %p453_p2 = scmp.ne.s32.totalorder %s657_s28, %s452_s3  ;;  %p458_p6 = scmp.lt.u32.totalorder %s657_s28, %s767_s0 }
  0x19   : > { %p459_p7 = scmp.lt.u32.totalorder %s457_s12, %s452_s3  ;;  %p461_p13 = scmp.lt.u32.totalorder %s452_s3, %s657_s28 }
  0x1a   : > { %p455_p4 = pnand %p454_p3, %p453_p2 }
  0x1b   : > { %p460_p10 = por %p459_p7, %p458_p6 }
  0x1c   : > { %p456_p5 = pneg %p455_p4 }
  0x1d   : > { %p462_p12 = por %p461_p13, %p460_p10 }
  0x1f   : > { %p463_p1 = pnand %p462_p12, %p456_p5 }
  0x21   : > { %466 = shalt.err (!%p463_p1)
}
  0x22   : > { %s467_s16 = scalar_lea.vmem %s659_s30, 768  ;;  %s566_s17 = smov [#allocation2]  }
  0x23   : > { %p468_p2 = scmp.ne.s32.totalorder %s659_s30, %s467_s16  ;;  %s472_s22 = sshll.u32 %s566_s17, 4  ;;  %s473_s22 = int_to_ptr.vmem [resolvable:$false] %s472_s22 }
  0x24   : > { %s474_s23 = scalar_lea.vmem %s473_s22, 1536  ;;  %p475_p9 = scmp.lt.s32.totalorder %s659_s30, %s473_s22 }
  0x25   : > { %p470_p4 = pnand %p468_p2, %p454_p3  ;;  %p476_p6 = scmp.lt.s32.totalorder %s474_s23, %s467_s16 }
  0x27   : > { %p471_p11 = pneg %p470_p4  ;;  %p477_p7 = por %p476_p6, %p475_p9 }
  0x29   : > { %p478_p10 = pnand %p477_p7, %p471_p11 }
  0x2b   : > { %481 = shalt.err (!%p478_p10)
}
  0x2c   : > { %s567_s24 = smov 128   ;;  %s568_s26 = smov 8  }
  0x2d   : > { %381 = dma.hbm_to_vmem [thread:$0]  (!%p650_p0), %s657_s28, 768, %s659_s30, %s662_s2, %s567_s24, %s567_s24, %s568_s26  }
  0x2e   : > { %p136_p12 = scmp.lt.s32.totalorder %s564_s11, 3  ;;  %p775_p1 = scmp.ge.s32.totalorder %s564_s11, 1 }
  0x30   : > { %p137_p3 = pnand %p775_p1, %p136_p12 }
  0x31   : > { %s694_s27 = sand.u32 (!%p137_p3), 1, %s548_s7  }
  0x32   : > { %140 = sbr.rel (%p137_p3) target bundleno = 107 (0x6b), region = 24  ;;  %s143_s3 = scalar_lea.sflag (!%p137_p3), [#allocation3], %s694_s27 }
  0x33   : > { %s372_s29 = smul.u32 (!%p137_p3), 48, %s694_s27 }
  0x35   : > { %s146_s4 = scalar_lea.vmem (!%p137_p3), [#allocation2], %s372_s29 }
  0x39   : > { %535 = dma.done.wait (%p629_p8), %s143_s3, 768  }
  0x3a   : > { %537 = vsyncadd (%p629_p8), %s143_s3, 4294966528  ;;  %v167_v0 = vld [vmem:[%s146_s4] sm:$0xff]  ;;  %v359_v1 = vld [vmem:[%s146_s4 + $0x10] sm:$0xff]  ;;  %vm211_vm0 = vcmask 130048   ;;  %s164_s18 = scalar_lea.vmem [#allocation5], %s372_s29  ;;  %s373_s28 = smul.u32 768, %s556_s9 }
  0x3b   : > { %v361_v2 = vld [vmem:[%s146_s4 + $0x20] sm:$0xff]  ;;  %v169_v3 = vmax.f32 %v167_v0, 1e-06  ;;  %v180_v4 = vmax.f32 %v359_v1, 1e-06  ;;  %v168_v6 = vld [vmem:[%s146_s4 + $0x8] sm:$0xff] }
  0x3c   : > { %v191_v5 = vmax.f32 %v361_v2, 1e-06  ;;  %v360_v7 = vld [vmem:[%s146_s4 + $0x18] sm:$0xff]  ;;  %v362_v8 = vld [vmem:[%s146_s4 + $0x28] sm:$0xff]  ;;  %v170_v9 = vmax.f32 %v168_v6, 1e-06  ;;  %s717_s9 = scalar_lea.hbm %s768_s1, %s373_s28 }
  0x3d   : > { %440 = vlog2.f32 %v169_v3  ;;  %v181_v10 = vmax.f32 %v360_v7, 1e-06  ;;  %v192_v11 = vmax.f32 %v362_v8, 1e-06  ;;  %s261_s25 = sshll.u32 %s164_s18, 4  ;;  %s245_s5 = scalar_lea.sflag [#allocation4], %s694_s27  ;;  %s710_s25 = int_to_ptr.vmem [resolvable:$true] %s261_s25 }
  0x3e   : > { %442 = vlog2.f32 %v180_v4  ;;  %s482_s12 = scalar_lea.vmem %s710_s25, 768  ;;  %p776_p9 = scmp.ne.s32.totalorder %s772_s19, 0 }
  0x3f   : > { %444 = vlog2.f32 %v191_v5  ;;  %p483_p8 = scmp.ne.s32.totalorder %s710_s25, %s482_s12  ;;  %s569_s13 = smov [#allocation5]  }
  0x40   : > { %446 = vlog2.f32 %v170_v9  ;;  %s486_s15 = sshll.u32 %s569_s13, 4  ;;  %s487_s15 = int_to_ptr.vmem [resolvable:$false] %s486_s15 }
  0x41   : > { %448 = vlog2.f32 %v181_v10  ;;  %p484_p11 = pnand %p483_p8, %p776_p9  ;;  %s488_s16 = scalar_lea.vmem %s487_s15, 1536 }
  0x42   : > { %450 = vlog2.f32 %v192_v11  ;;  %p489_p5 = scmp.lt.s32.totalorder %s710_s25, %s487_s15  ;;  %p490_p13 = scmp.lt.s32.totalorder %s488_s16, %s482_s12 }
  0x43   : > { %p485_p0 = pneg %p484_p11 }
  0x44   : > { %p491_p2 = por %p490_p13, %p489_p5 }
  0x46   : > { %p492_p4 = pnand %p491_p2, %p485_p0 }
  0x47   : > { %v441_v12 = vpop.eup %440 }
  0x48   : > { %v443_v13 = vpop.eup %442  ;;  %v172_v14 = vmul.f32 0.6931472, %v441_v12 }
  0x49   : > { %v445_v15 = vpop.eup %444  ;;  %v183_v16 = vmul.f32 0.6931472, %v443_v13 }
  0x4a   : > { %v447_v17 = vpop.eup %446  ;;  %v175_v18 = vmul.f32 -0.07238241, %v172_v14  ;;  %v194_v19 = vmul.f32 0.6931472, %v445_v15 }
  0x4b   : > { %v449_v20 = vpop.eup %448  ;;  %v186_v21 = vmul.f32 -0.07238241, %v183_v16  ;;  %v174_v22 = vmul.f32 0.6931472, %v447_v17 }
  0x4c   : > { %v451_v23 = vpop.eup %450  ;;  %v197_v24 = vmul.f32 -0.07238241, %v194_v19  ;;  %v199_v25 = vmul.f32 1.8779829, %v175_v18  ;;  %v185_v26 = vmul.f32 0.6931472, %v449_v20 }
  0x4d   : > { %v201_v27 = vmul.f32 -0.06590806, %v186_v21  ;;  %v176_v28 = vmul.f32 -0.07238241, %v174_v22  ;;  %v196_v29 = vmul.f32 0.6931472, %v451_v23 }
  0x4e   : > { %v205_v30 = vmul.f32 -0.60190743, %v197_v24  ;;  %v187_v31 = vmul.f32 -0.07238241, %v185_v26  ;;  %v214_v32 = vmul.f32 -1.0076787, %v175_v18 }
  0x4f   : > { %v203_v33 = vadd.f32 %v201_v27, %v199_v25  ;;  %v198_v34 = vmul.f32 -0.07238241, %v196_v29  ;;  %v200_v35 = vmul.f32 1.8779829, %v176_v28  ;;  %v216_v36 = vmul.f32 1.1347303, %v186_v21 }
  0x50   : > { %v202_v37 = vmul.f32 -0.06590806, %v187_v31  ;;  %v220_v38 = vmul.f32 -0.48041415, %v197_v24  ;;  %v215_v39 = vmul.f32 -1.0076787, %v176_v28 }
  0x51   : > { %v207_v40 = vadd.f32 %v205_v30, %v203_v33  ;;  %v206_v41 = vmul.f32 -0.60190743, %v198_v34  ;;  %v218_v42 = vadd.f32 %v216_v36, %v214_v32  ;;  %v217_v43 = vmul.f32 1.1347303, %v187_v31 }
  0x52   : > { %v204_v44 = vadd.f32 %v202_v37, %v200_v35  ;;  %v221_v45 = vmul.f32 -0.48041415, %v198_v34  ;;  %v229_v46 = vmul.f32 -0.55611587, %v175_v18  ;;  %v231_v47 = vmul.f32 -0.1355218, %v186_v21 }
  0x53   : > { %v209_v48 = vmax.f32 %v207_v40, 0.0  ;;  %v222_v49 = vadd.f32 %v220_v38, %v218_v42  ;;  %v219_v50 = vadd.f32 %v217_v43, %v215_v39  ;;  %v235_v51 = vmul.f32 1.5735881, %v197_v24 }
  0x54   : > { %v208_v52 = vadd.f32 %v206_v41, %v204_v44  ;;  %v233_v53 = vadd.f32 %v231_v47, %v229_v46  ;;  %v230_v54 = vmul.f32 -0.55611587, %v176_v28  ;;  %v232_v55 = vmul.f32 -0.1355218, %v187_v31 }
  0x55   : > { %212 = vst.msk [vmem:[%s164_s18] sm:$0xff] %vm211_vm0, %v209_v48  ;;  %v224_v56 = vmax.f32 %v222_v49, 0.0  ;;  %v223_v57 = vadd.f32 %v221_v45, %v219_v50  ;;  %v236_v58 = vmul.f32 1.5735881, %v198_v34 }
  0x56   : > { %v210_v59 = vmax.f32 %v208_v52, 0.0  ;;  %v237_v60 = vadd.f32 %v235_v51, %v233_v53  ;;  %v234_v61 = vadd.f32 %v232_v55, %v230_v54 }
  0x57   : > { %363 = vst.msk [vmem:[%s164_s18 + $0x10] sm:$0xff] %vm211_vm0, %v224_v56  ;;  %v225_v62 = vmax.f32 %v223_v57, 0.0 }
  0x58   : > { %213 = vst.msk [vmem:[%s164_s18 + $0x8] sm:$0xff] %vm211_vm0, %v210_v59  ;;  %v239_v63 = vmax.f32 %v237_v60, 0.0  ;;  %v238_v0 = vadd.f32 %v236_v58, %v234_v61 }
  0x59   : > { %364 = vst.msk [vmem:[%s164_s18 + $0x18] sm:$0xff] %vm211_vm0, %v225_v62 }
  0x5a   : > { %365 = vst.msk [vmem:[%s164_s18 + $0x20] sm:$0xff] %vm211_vm0, %v239_v63  ;;  %v240_v1 = vmax.f32 %v238_v0, 0.0 }
  0x5c   : > { %366 = vst.msk [vmem:[%s164_s18 + $0x28] sm:$0xff] %vm211_vm0, %v240_v1 }
  0x5d   : > { %495 = shalt.err (!%p492_p4)
}
  0x5e   : > { %s496_s17 = scalar_lea.hbm %s717_s9, 768  ;;  %s500_s24 = scalar_lea.hbm %s768_s1, 1536 }
  0x5f   : > { %p497_p6 = scmp.ne.s32.totalorder %s717_s9, %s496_s17  ;;  %p501_p12 = scmp.lt.u32.totalorder %s717_s9, %s768_s1 }
  0x60   : > { %p502_p1 = scmp.lt.u32.totalorder %s500_s24, %s496_s17  ;;  %p504_p8 = scmp.lt.u32.totalorder %s496_s17, %s717_s9 }
  0x61   : > { %p498_p7 = pnand %p497_p6, %p776_p9 }
  0x62   : > { %p503_p3 = por %p502_p1, %p501_p12 }
  0x63   : > { %p499_p10 = pneg %p498_p7 }
  0x64   : > { %p505_p11 = por %p504_p8, %p503_p3 }
  0x66   : > { %p506_p0 = pnand %p505_p11, %p499_p10 }
  0x68   : > { %509 = shalt.err (!%p506_p0)
}
  0x69   : > { %s570_s3 = smov 128   ;;  %s571_s4 = smov 8  }
  0x6a   : > { %376 = dma.vmem_to_hbm [thread:$0]  (%p776_p9), %s710_s25, 768, %s717_s9, %s245_s5, %s570_s3, %s570_s3, %s571_s4  }
  0x6b PF: > { %s276_s18 = sand.u32 1, %s544_s6   ;;  %p777_p5 = scmp.ne.s32.totalorder %s773_s21, 0 }
  0x6c   : > { %p778_p13 = scmp.ge.s32.totalorder %s564_s11, 2  ;;  %s277_s28 = scalar_lea.sflag [#allocation4], %s276_s18 }
  0x6e   : > { %p383_p2 = pnand %p778_p13, %p777_p5 }
  0x70   : > { %539 = dma.done.wait (!%p383_p2), %s277_s28, 768  }
  0x71   : > { %541 = vsyncadd (!%p383_p2), %s277_s28, 4294966528  ;;  %s17_s11 = sadd.s32 1, %s564_s11   ;;  %s779_s6 = smov %s548_s7 }
  0x72   : > { %p14_p4 = scmp.ge.s32.totalorder %s17_s11, 4   ;;  %s780_s7 = smov %s552_s8 }
  0x73   : > { %s781_s8 = smov %s638_s20  ;;  %s782_s9 = smov %s560_s10 }
  0x74   : > { %s783_s10 = smov %s785_s14  ;;  %16 = sbr.rel (!%p14_p4) target bundleno = 6 (0x6), region = 73 }
  0x7b   :  { %282 = vsyncpa [#allocation3], 1 }
  0x7c   :  { %284 = vsyncpa [#allocation3 + $0x1], 1 }
  0x7d   :  { %285 = vsyncpa [#allocation4], 1 }
  0x7e   :  { %287 = vsyncpa [#allocation4 + $0x1], 1 }

</bundles_post_ra>
